<compile_context>
chip_gen: v6e
topology: v6e:2x2x1
jax: 0.10.0
libtpu: 0.0.40
codegen_flags: <defaults>
</compile_context>

<pallas_src>
import functools

import jax
import jax.numpy as jnp
from jax.experimental import pallas as pl
from jax.experimental.pallas import tpu as pltpu

NEG_BIG = -1e30  # finite "-inf": padded vocab columns contribute exp(...) == 0


def _round_up(x, m):
    return ((x + m - 1) // m) * m


def cbow_kernel(idx_ref, emb_ref, w_ref, b_ref, out_ref,
                acc_ref, m_ref, l_ref, *, context_size):
    # idx_ref: (B_pad*C,) int32 in SMEM (scalar prefetch)
    # emb_ref: (V_rows, D_pad) f32 embedding table (VMEM resident)
    # w_ref:   (TILE_V, D_pad) bf16 linear-weight tile (nn.Linear layout)
    # b_ref:   (1, TILE_V) f32 bias tile (padded cols = -1e30)
    # out_ref: (NV, TILE_B, TILE_V) f32 logits / log-probs row block,
    #          VMEM-resident across the vocab grid axis
    # acc_ref: (TILE_B, D_pad) f32 context-embedding sum (per batch tile)
    # m_ref/l_ref: (TILE_B, 1) f32 online-softmax running max / sum(exp)
    i = pl.program_id(0)          # batch tile  ("parallel")
    j = pl.program_id(1)          # vocab tile  ("arbitrary")
    nv = pl.num_programs(1)

    tile_b, d_pad = acc_ref.shape

    # Once per batch tile: gather-sum context embeddings, reset running stats.
    @pl.when(j == 0)
    def _():
        m_ref[...] = jnp.full_like(m_ref, NEG_BIG)
        l_ref[...] = jnp.zeros_like(l_ref)

        def gather_row(r, carry):
            base = (i * tile_b + r) * context_size
            acc = jnp.zeros((1, d_pad), jnp.float32)
            for c in range(context_size):      # small static context: unrolled
                tok = idx_ref[base + c]
                acc = acc + emb_ref[pl.ds(tok, 1), :]
            acc_ref[pl.ds(r, 1), :] = acc
            return carry

        jax.lax.fori_loop(0, tile_b, gather_row, 0)

    # (TILE_B, D) @ (TILE_V, D)^T on the MXU: bf16 operands, f32 accumulation.
    logits = jax.lax.dot_general(
        acc_ref[...].astype(jnp.bfloat16), w_ref[...],
        dimension_numbers=(((1,), (1,)), ((), ())),
        preferred_element_type=jnp.float32) + b_ref[...]

    # Stash raw logits into the resident output block (dynamic leading index).
    out_ref[j] = logits

    # Online log-softmax statistics.
    tile_max = jnp.max(logits, axis=-1, keepdims=True)
    m_new = jnp.maximum(m_ref[...], tile_max)
    l_ref[...] = (l_ref[...] * jnp.exp(m_ref[...] - m_new)
                  + jnp.sum(jnp.exp(logits - m_new), axis=-1, keepdims=True))
    m_ref[...] = m_new

    # After the last vocab tile: normalize the whole row block in place.
    @pl.when(j == nv - 1)
    def _():
        out_ref[...] = out_ref[...] - (m_ref[...] + jnp.log(l_ref[...]))


def cbow_forward(indices, embedding, linear_w, linear_b,
                 *, tile_b=None, tile_v=None):
    """indices: (B, C) int32; embedding: (V, D) f32; linear_w: (V, D) f32
    (nn.Linear layout: out_features=V, in_features=D); linear_b: (V,) f32.
    Returns (B, V) f32 log-probabilities."""
    B, C = indices.shape
    V, D = embedding.shape

    # --- one-time parameter / layout prep (glue) -------------------------
    d_pad = _round_up(D, 128)                      # lane-dense matmuls
    if tile_v is None:
        tile_v = min(512, _round_up(V, 128))
    v_pad = _round_up(V, tile_v)
    if tile_b is None:
        # Keep the double-buffered, VMEM-resident (tile_b, v_pad) output
        # row block within ~8 MiB so it fits comfortably on v7x as well.
        budget = 8 * 1024 * 1024
        tb = max(8, min(128, (budget // (2 * v_pad * 4)) // 8 * 8))
        tile_b = min(tb, _round_up(B, 8))
    b_pad = _round_up(B, tile_b)
    v_rows = _round_up(V, 8)                       # table sublane padding

    emb_pad = jnp.zeros((v_rows, d_pad), jnp.float32).at[:V, :D].set(embedding)
    w_pad = jnp.zeros((v_pad, d_pad), jnp.bfloat16).at[:V, :D].set(
        linear_w.astype(jnp.bfloat16))
    bias_pad = jnp.full((1, v_pad), NEG_BIG, jnp.float32).at[0, :V].set(linear_b)
    idx_flat = jnp.zeros((b_pad * C,), jnp.int32).at[:B * C].set(
        indices.reshape(-1).astype(jnp.int32))

    nb = b_pad // tile_b
    nv = v_pad // tile_v

    grid_spec = pltpu.PrefetchScalarGridSpec(
        num_scalar_prefetch=1,                     # indices -> SMEM
        grid=(nb, nv),
        in_specs=[
            pl.BlockSpec((v_rows, d_pad), lambda i, j, idx: (0, 0)),   # table
            pl.BlockSpec((tile_v, d_pad), lambda i, j, idx: (j, 0)),   # weight
            pl.BlockSpec((1, tile_v), lambda i, j, idx: (0, j)),       # bias
        ],
        # Whole row block resident across the vocab axis; vocab tile indexed
        # on the leading dim so all stores stay lane-aligned.
        out_specs=pl.BlockSpec((nv, tile_b, tile_v), lambda i, j, idx: (0, i, 0)),
        scratch_shapes=[
            pltpu.VMEM((tile_b, d_pad), jnp.float32),   # context embedding sum
            pltpu.VMEM((tile_b, 1), jnp.float32),       # running max
            pltpu.VMEM((tile_b, 1), jnp.float32),       # running sum(exp)
        ],
    )

    out_pad = pl.pallas_call(
        functools.partial(cbow_kernel, context_size=C),
        out_shape=jax.ShapeDtypeStruct((nv, b_pad, tile_v), jnp.float32),
        grid_spec=grid_spec,
        compiler_params=pltpu.CompilerParams(
            dimension_semantics=("parallel", "arbitrary"),
            vmem_limit_bytes=32 * 1024 * 1024),
    )(idx_flat, emb_pad, w_pad, bias_pad)

    # (nv, b_pad, tile_v) -> (b_pad, v_pad): cheap layout un-shuffle.
    out_full = jnp.transpose(out_pad, (1, 0, 2)).reshape(b_pad, v_pad)
    return out_full[:B, :V]


if __name__ == "__main__":
    # Small, deterministic configuration
    VOCAB = 128     # vocab_size
    EMBED = 32      # embedding_dim
    BATCH = 8       # number of CBOW examples
    CTX = 4         # context window size (2 left + 2 right)

    key = jax.random.PRNGKey(0)
    k_idx, k_emb, k_w, k_b = jax.random.split(key, 4)

    indices = jax.random.randint(k_idx, (BATCH, CTX), 0, VOCAB, dtype=jnp.int32)
    embedding = 0.1 * jax.random.normal(k_emb, (VOCAB, EMBED), dtype=jnp.float32)
    linear_w = 0.1 * jax.random.normal(k_w, (VOCAB, EMBED), dtype=jnp.float32)
    linear_b = 0.1 * jax.random.normal(k_b, (VOCAB,), dtype=jnp.float32)

    out = cbow_forward(indices, embedding, linear_w, linear_b)
    out = jax.block_until_ready(out)

    # Pure-JAX reference check (f32)
    emb_sum_ref = jnp.sum(embedding[indices], axis=1)                 # (B, D)
    logits_ref = emb_sum_ref @ linear_w.T + linear_b                  # (B, V)
    log_probs_ref = jax.nn.log_softmax(logits_ref, axis=-1)
    assert out.shape == (BATCH, VOCAB)
    assert jnp.allclose(out, log_probs_ref, atol=1e-2), "mismatch vs reference"

    print("KERNEL_OK")
</pallas_src>

<mosaic_0001>
module attributes {stable_mosaic.version = 11 : i64} {
  func.func @cbow_kernel(%arg0: i32, %arg1: i32, %arg2: memref<32xi32, #tpu.memory_space<smem>>, %arg3: memref<128x128xf32, #tpu.memory_space<vmem>>, %arg4: memref<128x128xbf16, #tpu.memory_space<vmem>>, %arg5: memref<1x128xf32, #tpu.memory_space<vmem>>, %arg6: memref<1x8x128xf32, #tpu.memory_space<vmem>>, %arg7: memref<8x128xf32, #tpu.memory_space<vmem>>, %arg8: memref<8x1xf32, #tpu.memory_space<vmem>>, %arg9: memref<8x1xf32, #tpu.memory_space<vmem>>) attributes {dimension_semantics = [#tpu.dimension_semantics<parallel>, #tpu.dimension_semantics<arbitrary>], iteration_bounds = array<i64: 1, 1>, scalar_prefetch = 1 : i64, scratch_operands = 3 : i64, tpu.core_type = #tpu.core_type<tc>, window_params = [{pipeline_mode = #tpu.pipeline_mode<synchronous>, transform_indices = @transform_0, window_bounds = array<i64: 128, 128>}, {transform_indices = @transform_1, window_bounds = array<i64: 128, 128>}, {transform_indices = @transform_2, window_bounds = array<i64: 1, 128>}, {transform_indices = @transform_3, window_bounds = array<i64: 1, 8, 128>}]} {
    %c0_i32 = arith.constant 0 : i32
    %0 = arith.cmpi eq, %arg1, %c0_i32 : i32
    %1 = arith.extui %0 : i1 to i32
    %c0_i32_0 = arith.constant 0 : i32
    %2 = arith.cmpi ne, %1, %c0_i32_0 : i32
    scf.if %2 {
      %cst_22 = arith.constant -1.000000e+30 : f32
      %34 = vector.broadcast %cst_22 : f32 to vector<8x1xf32>
      %c0_23 = arith.constant 0 : index
      %c0_24 = arith.constant 0 : index
      %35 = vector.load %arg8[%c0_23, %c0_24] : memref<8x1xf32, #tpu.memory_space<vmem>>, vector<8x1xf32>
      tpu.vector_store %arg8[%c0_23, %c0_24], %34 {strides = array<i32>} : memref<8x1xf32, #tpu.memory_space<vmem>>, vector<8x1xf32>,
      %cst_25 = arith.constant 0.000000e+00 : f32
      %36 = vector.broadcast %cst_25 : f32 to vector<8x1xf32>
      %c0_26 = arith.constant 0 : index
      %c0_27 = arith.constant 0 : index
      %37 = vector.load %arg9[%c0_26, %c0_27] : memref<8x1xf32, #tpu.memory_space<vmem>>, vector<8x1xf32>
      tpu.vector_store %arg9[%c0_26, %c0_27], %36 {strides = array<i32>} : memref<8x1xf32, #tpu.memory_space<vmem>>, vector<8x1xf32>,
      %c0_i32_28 = arith.constant 0 : i32
      %c8_i32 = arith.constant 8 : i32
      %38 = arith.addi %c0_i32_28, %c8_i32 : i32
      %c1_i32 = arith.constant 1 : i32
      scf.for %arg10 = %c0_i32_28 to %38 step %c1_i32  : i32 {
        %c8_i32_30 = arith.constant 8 : i32
        %39 = arith.muli %arg0, %c8_i32_30 : i32
        %40 = arith.addi %39, %arg10 : i32
        %c4_i32 = arith.constant 4 : i32
        %41 = arith.muli %40, %c4_i32 : i32
        %cst_31 = arith.constant 0.000000e+00 : f32
        %42 = vector.broadcast %cst_31 : f32 to vector<1x128xf32>
        %c0_i32_32 = arith.constant 0 : i32
        %43 = arith.addi %41, %c0_i32_32 : i32
        %44 = arith.index_cast %43 : i32 to index
        %45 = memref.load %arg2[%44] : memref<32xi32, #tpu.memory_space<smem>>
        %46 = arith.index_cast %45 : i32 to index
        %c0_33 = arith.constant 0 : index
        %47 = vector.load %arg3[%46, %c0_33] : memref<128x128xf32, #tpu.memory_space<vmem>>, vector<1x128xf32>
        %48 = arith.addf %42, %47 : vector<1x128xf32>
        %c1_i32_34 = arith.constant 1 : i32
        %49 = arith.addi %41, %c1_i32_34 : i32
        %50 = arith.index_cast %49 : i32 to index
        %51 = memref.load %arg2[%50] : memref<32xi32, #tpu.memory_space<smem>>
        %52 = arith.index_cast %51 : i32 to index
        %c0_35 = arith.constant 0 : index
        %53 = vector.load %arg3[%52, %c0_35] : memref<128x128xf32, #tpu.memory_space<vmem>>, vector<1x128xf32>
        %54 = arith.addf %48, %53 : vector<1x128xf32>
        %c2_i32 = arith.constant 2 : i32
        %55 = arith.addi %41, %c2_i32 : i32
        %56 = arith.index_cast %55 : i32 to index
        %57 = memref.load %arg2[%56] : memref<32xi32, #tpu.memory_space<smem>>
        %58 = arith.index_cast %57 : i32 to index
        %c0_36 = arith.constant 0 : index
        %59 = vector.load %arg3[%58, %c0_36] : memref<128x128xf32, #tpu.memory_space<vmem>>, vector<1x128xf32>
        %60 = arith.addf %54, %59 : vector<1x128xf32>
        %c3_i32 = arith.constant 3 : i32
        %61 = arith.addi %41, %c3_i32 : i32
        %62 = arith.index_cast %61 : i32 to index
        %63 = memref.load %arg2[%62] : memref<32xi32, #tpu.memory_space<smem>>
        %64 = arith.index_cast %63 : i32 to index
        %c0_37 = arith.constant 0 : index
        %65 = vector.load %arg3[%64, %c0_37] : memref<128x128xf32, #tpu.memory_space<vmem>>, vector<1x128xf32>
        %66 = arith.addf %60, %65 : vector<1x128xf32>
        %67 = arith.index_cast %arg10 : i32 to index
        %c0_38 = arith.constant 0 : index
        %68 = vector.load %arg7[%67, %c0_38] : memref<8x128xf32, #tpu.memory_space<vmem>>, vector<1x128xf32>
        tpu.vector_store %arg7[%67, %c0_38], %66 {strides = array<i32>} : memref<8x128xf32, #tpu.memory_space<vmem>>, vector<1x128xf32>,
      }
      %c8_i32_29 = arith.constant 8 : i32
    } else {
    }
    %c0 = arith.constant 0 : index
    %c0_1 = arith.constant 0 : index
    %3 = vector.load %arg7[%c0, %c0_1] : memref<8x128xf32, #tpu.memory_space<vmem>>, vector<8x128xf32>
    %4 = arith.truncf %3 : vector<8x128xf32> to vector<8x128xbf16>
    %c0_2 = arith.constant 0 : index
    %c0_3 = arith.constant 0 : index
    %5 = vector.load %arg4[%c0_2, %c0_3] : memref<128x128xbf16, #tpu.memory_space<vmem>>, vector<128x128xbf16>
    %cst = arith.constant dense<0.000000e+00> : vector<8x128xf32>
    %6 = tpu.matmul %4, %5, %cst {dimension_numbers = #tpu.dot_dimension_numbers<[1], [1], [0], [0], [0, 0, 1, 0], [], []>} : vector<8x128xbf16>, vector<128x128xbf16>, vector<8x128xf32> -> vector<8x128xf32>
    %c0_4 = arith.constant 0 : index
    %c0_5 = arith.constant 0 : index
    %7 = vector.load %arg5[%c0_4, %c0_5] : memref<1x128xf32, #tpu.memory_space<vmem>>, vector<1x128xf32>
    %8 = vector.broadcast %7 : vector<1x128xf32> to vector<8x128xf32>
    %9 = arith.addf %6, %8 : vector<8x128xf32>
    %10 = arith.index_cast %arg1 : i32 to index
    %c0_6 = arith.constant 0 : index
    %c0_7 = arith.constant 0 : index
    %11 = vector.load %arg6[%10, %c0_6, %c0_7] : memref<1x8x128xf32, #tpu.memory_space<vmem>>, vector<1x8x128xf32>
    %12 = vector.shape_cast %11 : vector<1x8x128xf32> to vector<8x128xf32>
    %13 = vector.shape_cast %9 : vector<8x128xf32> to vector<1x8x128xf32>
    tpu.vector_store %arg6[%10, %c0_6, %c0_7], %13 {strides = array<i32>} : memref<1x8x128xf32, #tpu.memory_space<vmem>>, vector<1x8x128xf32>,
    %cst_8 = arith.constant dense<0xFF800000> : vector<8xf32>
    %14 = vector.multi_reduction <maximumf>, %9, %cst_8 [1] : vector<8x128xf32> to vector<8xf32>
    %15 = vector.shape_cast %14 : vector<8xf32> to vector<8x1xf32>
    %c0_9 = arith.constant 0 : index
    %c0_10 = arith.constant 0 : index
    %16 = vector.load %arg8[%c0_9, %c0_10] : memref<8x1xf32, #tpu.memory_space<vmem>>, vector<8x1xf32>
    %17 = arith.maximumf %16, %15 : vector<8x1xf32>
    %c0_11 = arith.constant 0 : index
    %c0_12 = arith.constant 0 : index
    %18 = vector.load %arg9[%c0_11, %c0_12] : memref<8x1xf32, #tpu.memory_space<vmem>>, vector<8x1xf32>
    %c0_13 = arith.constant 0 : index
    %c0_14 = arith.constant 0 : index
    %19 = vector.load %arg8[%c0_13, %c0_14] : memref<8x1xf32, #tpu.memory_space<vmem>>, vector<8x1xf32>
    %20 = arith.subf %19, %17 : vector<8x1xf32>
    %21 = math.exp %20 : vector<8x1xf32>
    %22 = arith.mulf %18, %21 : vector<8x1xf32>
    %23 = vector.broadcast %17 : vector<8x1xf32> to vector<8x128xf32>
    %24 = arith.subf %9, %23 : vector<8x128xf32>
    %25 = math.exp %24 : vector<8x128xf32>
    %cst_15 = arith.constant dense<0.000000e+00> : vector<8xf32>
    %26 = vector.multi_reduction <add>, %25, %cst_15 [1] : vector<8x128xf32> to vector<8xf32>
    %27 = vector.shape_cast %26 : vector<8xf32> to vector<8x1xf32>
    %28 = arith.addf %22, %27 : vector<8x1xf32>
    %c0_16 = arith.constant 0 : index
    %c0_17 = arith.constant 0 : index
    %29 = vector.load %arg9[%c0_16, %c0_17] : memref<8x1xf32, #tpu.memory_space<vmem>>, vector<8x1xf32>
    tpu.vector_store %arg9[%c0_16, %c0_17], %28 {strides = array<i32>} : memref<8x1xf32, #tpu.memory_space<vmem>>, vector<8x1xf32>,
    %c0_18 = arith.constant 0 : index
    %c0_19 = arith.constant 0 : index
    %30 = vector.load %arg8[%c0_18, %c0_19] : memref<8x1xf32, #tpu.memory_space<vmem>>, vector<8x1xf32>
    tpu.vector_store %arg8[%c0_18, %c0_19], %17 {strides = array<i32>} : memref<8x1xf32, #tpu.memory_space<vmem>>, vector<8x1xf32>,
    %c0_i32_20 = arith.constant 0 : i32
    %31 = arith.cmpi eq, %arg1, %c0_i32_20 : i32
    %32 = arith.extui %31 : i1 to i32
    %c0_i32_21 = arith.constant 0 : i32
    %33 = arith.cmpi ne, %32, %c0_i32_21 : i32
    scf.if %33 {
      %c0_22 = arith.constant 0 : index
      %c0_23 = arith.constant 0 : index
      %c0_24 = arith.constant 0 : index
      %34 = vector.load %arg6[%c0_22, %c0_23, %c0_24] : memref<1x8x128xf32, #tpu.memory_space<vmem>>, vector<1x8x128xf32>
      %c0_25 = arith.constant 0 : index
      %c0_26 = arith.constant 0 : index
      %35 = vector.load %arg8[%c0_25, %c0_26] : memref<8x1xf32, #tpu.memory_space<vmem>>, vector<8x1xf32>
      %c0_27 = arith.constant 0 : index
      %c0_28 = arith.constant 0 : index
      %36 = vector.load %arg9[%c0_27, %c0_28] : memref<8x1xf32, #tpu.memory_space<vmem>>, vector<8x1xf32>
      %37 = math.log %36 : vector<8x1xf32>
      %38 = arith.addf %35, %37 : vector<8x1xf32>
      %39 = vector.shape_cast %38 : vector<8x1xf32> to vector<1x8x1xf32>
      %40 = vector.broadcast %39 : vector<1x8x1xf32> to vector<1x8x128xf32>
      %41 = arith.subf %34, %40 : vector<1x8x128xf32>
      %c0_29 = arith.constant 0 : index
      %c0_30 = arith.constant 0 : index
      %c0_31 = arith.constant 0 : index
      %42 = vector.load %arg6[%c0_29, %c0_30, %c0_31] : memref<1x8x128xf32, #tpu.memory_space<vmem>>, vector<1x8x128xf32>
      tpu.vector_store %arg6[%c0_29, %c0_30, %c0_31], %41 {strides = array<i32>} : memref<1x8x128xf32, #tpu.memory_space<vmem>>, vector<1x8x128xf32>,
    } else {
    }
    return
  }
  func.func @transform_0(%arg0: i32, %arg1: i32, %arg2: memref<32xi32, #tpu.memory_space<smem>>) -> (i32, i32) {
    %c0_i32 = arith.constant 0 : i32
    %c0_i32_0 = arith.constant 0 : i32
    %c0_i32_1 = arith.constant 0 : i32
    return %c0_i32, %c0_i32_0 : i32, i32
  }
  func.func @transform_1(%arg0: i32, %arg1: i32, %arg2: memref<32xi32, #tpu.memory_space<smem>>) -> (i32, i32) {
    %c0_i32 = arith.constant 0 : i32
    %c0_i32_0 = arith.constant 0 : i32
    return %arg1, %c0_i32 : i32, i32
  }
  func.func @transform_2(%arg0: i32, %arg1: i32, %arg2: memref<32xi32, #tpu.memory_space<smem>>) -> (i32, i32) {
    %c0_i32 = arith.constant 0 : i32
    %c0_i32_0 = arith.constant 0 : i32
    return %c0_i32, %arg1 : i32, i32
  }
  func.func @transform_3(%arg0: i32, %arg1: i32, %arg2: memref<32xi32, #tpu.memory_space<smem>>) -> (i32, i32, i32) {
    %c0_i32 = arith.constant 0 : i32
    %c0_i32_0 = arith.constant 0 : i32
    %c0_i32_1 = arith.constant 0 : i32
    return %c0_i32, %arg0, %c0_i32_0 : i32, i32, i32
  }
}

</mosaic_0001>

<bundles_post_ra>
// kernel: tpu_custom_call.1
= control target key start
LH: loop header
LB: loop body
LE: loop exit
PB: predicated region body
PF: predicated region fallthrough
CT: control target
= control target key end

     0   :  { %s426_s15 = smov [#allocation6]   ;;  %s482_s0 = inlined_call_operand.hbm [shape: s32[32], index: 0, kind: input, shape index: {}]   ;;  %s483_s1 = inlined_call_operand.hbm [shape: f32[128,128], index: 1, kind: input, shape index: {}]   ;;  %s484_s2 = inlined_call_operand.hbm [shape: bf16[128,128], index: 2, kind: input, shape index: {}]   ;;  %s485_s3 = inlined_call_operand.vmem [shape: f32[1,128], index: 3, kind: input, shape index: {}]   ;;  %s486_s4 = inlined_call_operand.hbm [shape: f32[1,8,128], index: 4, kind: output, shape index: {}]  }
   0x1   :  { %10 = dma.hbm_to_smem %s482_s0, 16, %s426_s15, [#allocation5] }
   0x2   :  { %414 = dma.done.wait [#allocation5], 16 }
   0x3   :  { %415 = vsyncadd [#allocation5], 4294967280 }
   0x4   :  { %12 = sfence }
   0x5   :  { %13 = vsyncpa [#allocation8], 0 }
   0x6   :  { %14 = vsyncpa [#allocation11], 0 }
   0x7   :  { %15 = vsyncpa [#allocation9], 0  ;;  %s427_s18 = smov [#allocation7]  }
   0x8   :  { %s21_s19 = sshll.u32 %s427_s18, 4  ;;  %s22_s19 = int_to_ptr.vmem [resolvable:$true] %s21_s19 }
   0x9   :  { %s358_s20 = scalar_lea.vmem %s22_s19, 2048  ;;  %p363_p1 = scmp.lt.s32.totalorder %s22_s19, %s22_s19 }
   0xa   :  { %p359_p0 = scmp.ne.s32.totalorder %s22_s19, %s358_s20  ;;  %p364_p2 = scmp.lt.s32.totalorder %s358_s20, %s358_s20 }
   0xc   :  { %p365_p3 = por %p364_p2, %p363_p1 }
   0xe   :  { %p366_p4 = pnand %p365_p3, %p359_p0 }
  0x10   :  { %369 = shalt.err (!%p366_p4)
}
  0x11   :  { %s428_s21 = smov 128   ;;  %s429_s22 = smov 8  }
  0x12   :  { %27 = dma.hbm_to_vmem [thread:$0]  %s483_s1, 2048, %s22_s19, [#allocation8], %s428_s21, %s428_s21, %s429_s22  }
  0x13   :  { %s430_s24 = smov [#allocation10]  }
  0x14   :  { %s33_s25 = sshll.u32 %s430_s24, 4  ;;  %s34_s25 = int_to_ptr.vmem [resolvable:$true] %s33_s25 }
  0x15   :  { %s378_s26 = scalar_lea.vmem %s34_s25, 1024  ;;  %p383_p6 = scmp.lt.s32.totalorder %s34_s25, %s34_s25 }
  0x16   :  { %p379_p5 = scmp.ne.s32.totalorder %s34_s25, %s378_s26  ;;  %p384_p7 = scmp.lt.s32.totalorder %s378_s26, %s378_s26 }
  0x18   :  { %p385_p8 = por %p384_p7, %p383_p6 }
  0x1a   :  { %p386_p9 = pnand %p385_p8, %p379_p5 }
  0x1c   :  { %389 = shalt.err (!%p386_p9)
}
  0x1d   :  { %s431_s27 = smov 64   ;;  %s432_s28 = smov 4  }
  0x1e   :  { %39 = dma.hbm_to_vmem [thread:$0]  %s484_s2, 1024, %s34_s25, [#allocation11], %s431_s27, %s431_s27, %s432_s28  }
  0x1f   :  { %416 = dma.done.wait [#allocation8], 2048  }
  0x20   :  { %417 = vsyncadd [#allocation8], 4294965248 }
  0x21   :  { %418 = dma.done.wait [#allocation11], 1024  }
  0x22   :  { %419 = vsyncadd [#allocation11], 4294966272  ;;  %vm53_vm0 = vcmask 7168   ;;  %v433_v0 = vmov -1e+30   ;;  %v434_v1 = vmov 0.0  }
  0x23   :  { %54 = vst.msk [vmem:[#allocation3] sm:$0xff] %vm53_vm0, %v433_v0  ;;  %55 = vst.msk [vmem:[#allocation4] sm:$0xff] %vm53_vm0, %v434_v1  ;;  %s422_s1 = smov 0  }
  0x24 LB: > { %s267_s5 = sshll.u32 %s424_s1, 2  ;;  %s84_s16 = scalar_lea.vmem [#allocation2], %s424_s1  ;;  %s424_s1 = sphi %s422_s1, %s61_s1  }
  0x25   : > { %s65_s6 = sld [smem:[#allocation6 + %s267_s5]]  ;;  %s69_s7 = sadd.s32 1, %s267_s5 }
  0x26   : > { %s70_s8 = sld [smem:[#allocation6 + %s69_s7]]  ;;  %s74_s2 = sadd.s32 2, %s267_s5 }
  0x27   : > { %s75_s9 = sld [smem:[#allocation6 + %s74_s2]]  ;;  %s79_s10 = sadd.s32 3, %s267_s5 }
  0x28   : > { %s80_s11 = sld [smem:[#allocation6 + %s79_s10]]  ;;  %s61_s1 = sadd.s32 1, %s424_s1  }
  0x29   : > { %p58_p10 = scmp.ge.s32.totalorder %s61_s1, 8  }
  0x2a   :  { %286 = vmatprep.subr.bf16.mxu0 (%p58_p10), %v434_v1  ;;  %v328_v9 = vld [vmem:[#allocation10 + $0x38] sm:$0xff] (%p58_p10)   ;;  %vm435_vm1 = vmmov (%p58_p10), 0   ;;  %v329_v10 = vld [vmem:[#allocation10 + $0x30] sm:$0xff] (%p58_p10)   ;;  %v330_v11 = vld [vmem:[#allocation10 + $0x28] sm:$0xff] (%p58_p10)   ;;  %v436_v25 = vmov (%p58_p10), 0  }
  0x2b   : > { %s66_s12 = scalar_lea.vmem [#allocation7], %s65_s6  ;;  %302 = vmatprep.mubr.msk.bf16.mxu0 (%p58_p10), %vm435_vm1, %v434_v1  ;;  %287 = vmatpush3.bf16.xpose.msra.mxu0 (%p58_p10), %v328_v9  ;;  %v331_v12 = vld [vmem:[#allocation10 + $0x20] sm:$0xff] (%p58_p10)   ;;  %v332_v13 = vld [vmem:[#allocation10 + $0x18] sm:$0xff] (%p58_p10)   ;;  %v333_v14 = vld [vmem:[#allocation10 + $0x10] sm:$0xff] (%p58_p10)  }
  0x2c   : > { %v67_v2 = vld [vmem:[%s66_s12] sm:$0x1]  ;;  %s71_s13 = scalar_lea.vmem [#allocation7], %s70_s8  ;;  %288 = vmatprep.subr.bf16.mxu0 (%p58_p10), %v434_v1  ;;  %v335_v16 = vld [vmem:[#allocation10] sm:$0xff] (%p58_p10)   ;;  %326 = vset.pattern.permute.xlu0 (%p58_p10), %v436_v25  ;;  %v204_v26 = vld [vmem:[#allocation3] sm:$0xff] (%p58_p10) }
  0x2d   : > { %v72_v3 = vld [vmem:[%s71_s13] sm:$0x1]  ;;  %s76_s14 = scalar_lea.vmem [#allocation7], %s75_s9  ;;  %327 = vset.pattern.permute.xlu1 (%p58_p10), %v436_v25  ;;  %v206_v36 = vld [vmem:[#allocation4] sm:$0xff] (%p58_p10) }
  0x2e   : > { %v73_v4 = vadd.f32 %v72_v3, %v67_v2  ;;  %v77_v5 = vld [vmem:[%s76_s14] sm:$0x1]  ;;  %s81_s15 = scalar_lea.vmem [#allocation7], %s80_s11 }
  0x2f   : > { %v82_v6 = vld [vmem:[%s81_s15] sm:$0x1] }
  0x30   : > { %v78_v7 = vadd.f32 %v77_v5, %v73_v4  ;;  %60 = sbr.rel (!%p58_p10) target bundleno = 36 (0x24), region = 61  ;;  %v334_v15 = vld [vmem:[#allocation10 + $0x8] sm:$0xff] (%p58_p10)  }
  0x31   :  { %v268_v19 = vld [vmem:[%s485_s3] ss:$0 sm:$0xff] (%p58_p10)  ;;  %s437_s3 = smov (%p58_p10), [#allocation12]  }
  0x32   : > { %v83_v8 = vadd.f32 %v82_v6, %v78_v7  ;;  %s247_s19 = sshll.u32 (%p58_p10), %s437_s3, 4  ;;  %s248_s19 = int_to_ptr.vmem [resolvable:$true] %s247_s19 }
  0x33   :  { %289 = vmatpush3.bf16.xpose.msra.mxu0 (%p58_p10), %v329_v10  ;;  %s390_s20 = scalar_lea.vmem (%p58_p10), %s248_s19, 128  ;;  %p395_p12 = scmp.lt.s32.totalorder (%p58_p10), %s248_s19, %s248_s19 }
  0x34   : > { %85 = vst [vmem:[%s84_s16] sm:$0x1] %v83_v8  ;;  %290 = vmatprep.subr.bf16.mxu0 (%p58_p10), %v434_v1  ;;  %p391_p11 = scmp.ne.s32.totalorder (%p58_p10), %s248_s19, %s390_s20  ;;  %p396_p13 = scmp.lt.s32.totalorder (%p58_p10), %s390_s20, %s390_s20 }
  0x36   :  { %p397_p0 = por %p396_p13, %p395_p12 }
  0x38   :  { %p398_p1 = pnand %p397_p0, %p391_p11 }
  0x3b   :  { %291 = vmatpush3.bf16.xpose.msra.mxu0 %v330_v11  ;;  %v86_v17 = vld [vmem:[#allocation2] sm:$0xff] }
  0x3c   :  { %292 = vmatprep.subr.bf16.mxu0 %v434_v1  ;;  %v87_v18 = vpack.c.bf16 %v86_v17, %v86_v17 }
  0x43   :  { %293 = vmatpush3.bf16.xpose.msra.mxu0 %v331_v12 }
  0x44   :  { %294 = vmatprep.subr.bf16.mxu0 %v434_v1 }
  0x4b   :  { %295 = vmatpush3.bf16.xpose.msra.mxu0 %v332_v13 }
  0x4c   :  { %296 = vmatprep.subr.bf16.mxu0 %v434_v1 }
  0x53   :  { %297 = vmatpush3.bf16.xpose.msra.mxu0 %v333_v14 }
  0x54   :  { %298 = vmatprep.subr.bf16.mxu0 %v434_v1 }
  0x5b   :  { %299 = vmatpush3.bf16.xpose.msra.mxu0 %v334_v15 }
  0x5c   :  { %300 = vmatprep.subr.bf16.mxu0 %v434_v1 }
  0x63   :  { %301 = vmatpush3.bf16.xpose.msra.mxu0 %v335_v16 }
  0x6a   :  { %303 = vmatmul.mubr.bf16.vlgmr.msra.gmra.mxu0 %v87_v18 }
 0x12a   :  { %v193_v20 = vpop.f32.mrf.mxu0 }
 0x12b   :  { %v194_v21 = vadd.f32 %v268_v19, %v193_v20 }
 0x12c   :  { %v304_v22 = vpop.f32.mrf.mxu0 }
 0x12d   :  { %202 = vmax.xlane.f32.xlu0 %v194_v21 }
 0x12e   :  { %v196_v23 = vpop.f32.mrf.mxu0 }
 0x130   :  { %v305_v24 = vpop.f32.mrf.mxu0 }
 0x1b6   :  { %v203_v27 = vpop.xlane.xlu0 %202 }
 0x1b7   :  { %v205_v28 = vmax.f32 %v204_v26, %v203_v27 }
 0x1b9   :  { %v207_v29 = vsub.f32 %v204_v26, %v205_v28  ;;  %224 = vst.msk [vmem:[#allocation3] sm:$0xff] %vm53_vm0, %v205_v28  ;;  %213 = vperm.xlu0 %326, %v205_v28  }
 0x1bb   :  { %v208_v34 = vmul.f32 1.442695, %v207_v29 }
 0x1c0   :  { %v229_v43 = vld [vmem:[#allocation3] sm:$0xff] }
 0x234   :  { %v214_v30 = vpop.permute.xlu0 %213 }
 0x235   :  { %v216_v31 = vsub.f32 %v194_v21, %v214_v30 }
 0x237   :  { %v217_v32 = vmul.f32 1.442695, %v216_v31 }
 0x239   :  { %336 = vpow2.f32 %v217_v32 }
 0x23a   :  { %338 = vpow2.f32 %v208_v34 }
 0x246   :  { %v337_v33 = vpop.eup %336 }
 0x247   :  { %219 = vadd.xlane.f32.xlu1 %v337_v33  ;;  %v339_v35 = vpop.eup %338 }
 0x248   :  { %v210_v37 = vmul.f32 %v339_v35, %v206_v36 }
 0x2d0   :  { %v220_v38 = vpop.xlane.xlu1 %219 }
 0x2d1   :  { %v221_v39 = vadd.f32 %v220_v38, %v210_v37 }
 0x2d3   :  { %223 = vst.msk [vmem:[#allocation4] sm:$0xff] %vm53_vm0, %v221_v39 }
 0x2da   :  { %v230_v40 = vld [vmem:[#allocation4] sm:$0xff] }
 0x2db   :  { %340 = vlog2.f32 %v230_v40 }
 0x2e8   :  { %v341_v41 = vpop.eup %340 }
 0x2e9   :  { %v232_v42 = vmul.f32 0.6931472, %v341_v41 }
 0x2eb   :  { %v233_v44 = vadd.f32 %v232_v42, %v229_v43 }
 0x2ed   :  { %236 = vperm.xlu1 %327, %v233_v44  }
 0x368   :  { %v237_v45 = vpop.permute.xlu1 %236 }
 0x369   :  { %v239_v46 = vsub.f32 %v194_v21, %v237_v45 }
 0x36b   :  { %240 = vst [vmem:[#allocation12] sm:$0xff] %v239_v46 }
 0x36c   :  { %401 = shalt.err (!%p398_p1)
}
 0x36d   :  { %250 = dma.vmem_to_hbm [thread:$0]  %s248_s19, 128, %s486_s4, [#allocation9]  }
 0x36e   :  { %420 = dma.done.wait [#allocation9], 128  }
 0x36f   :  { %421 = vsyncadd [#allocation9], 4294967168 }
 0x370   :  { %254 = vsyncpa [#allocation8], 1 }
 0x371   :  { %255 = vsyncpa [#allocation11], 1 }
 0x372   :  { %256 = vsyncpa [#allocation9], 1 }

</bundles_post_ra>
